<compile_context>
chip_gen: v7x
topology: tpu7x:2x2x1
jax: 0.10.0
libtpu: 0.0.40
codegen_flags: <defaults>
</compile_context>

<pallas_src>
import jax
import jax.numpy as jnp
from jax.experimental import pallas as pl
from jax.experimental.pallas import tpu as pltpu


# ---------------------------------------------------------------------------
# Kernel
# ---------------------------------------------------------------------------
def _trace_kernel(omt_ref, x_ref, state_ref, out_ref):
    # state_new = state * (1 - tau) + x, computed in f32; cast only the result.
    s = state_ref[...].astype(jnp.float32)
    x = x_ref[...].astype(jnp.float32)
    out_ref[...] = (s * omt_ref[...] + x).astype(out_ref.dtype)


# ---------------------------------------------------------------------------
# Tiling helpers
# ---------------------------------------------------------------------------
_TARGET_BLOCK_BYTES = 2 * 1024 * 1024   # ~2 MiB blocks: near HBM roofline
_MIN_BLOCK_BYTES = 512 * 1024           # don't shrink below this chasing steps
_DESIRED_STEPS = 8                      # >=4 steps per TC on v7x (2 TCs)


def _round_down_mult(v, m):
    return (v // m) * m


def _round_up_mult(v, m):
    return ((v + m - 1) // m) * m


def _pick_tile_b(B, H, itemsize):
    """Batch-tile rows: bytes-per-block target with a step-count goal."""
    row_bytes = max(H * itemsize, 1)
    if B <= 8:
        return B                                    # full dim -> always legal
    tile_target = _TARGET_BLOCK_BYTES // row_bytes  # ~2 MiB block
    tile_steps = _round_up_mult(pl.cdiv(B, _DESIRED_STEPS), 8)
    tile_min = _round_up_mult(pl.cdiv(_MIN_BLOCK_BYTES, row_bytes), 8)
    tile = max(tile_min, min(tile_target, tile_steps))
    tile = max(8, _round_down_mult(tile, 8))        # f32 sublane multiple
    if tile >= B:
        return B
    return tile


def _lane_dense_fold(B, H):
    """Smallest g with (g*H) % 128 == 0 and B % g == 0 (g == 1: no fold)."""
    if H % 128 == 0:
        return 1
    for g in range(2, 129):
        if (g * H) % 128 == 0 and B % g == 0:
            return g
    return 1


# ---------------------------------------------------------------------------
# Wrapper
# ---------------------------------------------------------------------------
def trace_layer_forward(x, state, tau):
    """x, state: (B, H); tau: (H,). Returns state_new = state * (1 - tau) + x."""
    B, H = x.shape
    dt = x.dtype
    itemsize = jnp.dtype(dt).itemsize

    # Decay coefficient kept in f32 regardless of activation dtype.
    one_minus_tau = (1.0 - tau.astype(jnp.float32)).reshape(1, H)

    # Layout plumbing: fold g consecutive batch rows into the lane dim when H
    # is not a multiple of 128, so output stores are lane-dense.
    g = _lane_dense_fold(B, H)
    if g > 1:
        xk = x.reshape(B // g, g * H)
        statek = state.reshape(B // g, g * H)
        omt = jnp.tile(one_minus_tau, (1, g))
        Bk, Hk = B // g, g * H
    else:
        xk, statek, omt = x, state, one_minus_tau
        Bk, Hk = B, H

    tile_b = _pick_tile_b(Bk, Hk, itemsize)
    nb = pl.cdiv(Bk, tile_b)

    # Explicit VMEM limit: 3 streams (x, state, out) double-buffered + param.
    block_bytes = tile_b * Hk * itemsize
    param_bytes = Hk * 4
    vmem_need = 3 * 2 * block_bytes + 2 * param_bytes
    vmem_limit = min(max(int(vmem_need * 3 // 2) + (1 << 20), 16 << 20), 48 << 20)

    bh_spec = pl.BlockSpec((tile_b, Hk), lambda i: (i, 0))
    param_spec = pl.BlockSpec((1, Hk), lambda i: (0, 0))   # constant -> resident

    out = pl.pallas_call(
        _trace_kernel,
        out_shape=jax.ShapeDtypeStruct((Bk, Hk), dt),
        grid=(nb,),
        in_specs=[param_spec, bh_spec, bh_spec],
        out_specs=bh_spec,
        input_output_aliases={2: 0},   # state -> output (in place if donated)
        compiler_params=pltpu.CompilerParams(
            dimension_semantics=("parallel",),
            vmem_limit_bytes=vmem_limit,
        ),
    )(omt, xk, statek)

    if g > 1:
        out = out.reshape(B, H)
    return out


def _reference(x, state, tau):
    return state * (1.0 - tau) + x


# ---------------------------------------------------------------------------
# Self-test
# ---------------------------------------------------------------------------
if __name__ == "__main__":
    key = jax.random.PRNGKey(0)
    k = jax.random.split(key, 12)

    # 1) Small shapes consistent with TraceLayer(size=32): batch=2, hidden=32.
    B, H = 2, 32
    tau = jax.random.uniform(k[0], (H,), jnp.float32)   # mirrors torch.rand(size)
    x = jax.random.normal(k[1], (B, H), jnp.float32)
    state = jax.random.normal(k[2], (B, H), jnp.float32)
    expected = _reference(x, state, tau)                 # computed before the call
    out = trace_layer_forward(x, state, tau)
    jax.block_until_ready(out)
    assert out.shape == (B, H)
    assert jnp.allclose(out, expected, atol=1e-6), "mismatch (small case)"

    # 2) Lane-dense fold path: H=32 not a multiple of 128, B divisible by g=4.
    B2, H2 = 8, 32
    tau2 = jax.random.uniform(k[3], (H2,), jnp.float32)
    x2 = jax.random.normal(k[4], (B2, H2), jnp.float32)
    state2 = jax.random.normal(k[5], (B2, H2), jnp.float32)
    expected2 = _reference(x2, state2, tau2)
    out2 = trace_layer_forward(x2, state2, tau2)
    jax.block_until_ready(out2)
    assert out2.shape == (B2, H2)
    assert jnp.allclose(out2, expected2, atol=1e-6), "mismatch (lane-fold case)"

    # 3) Tiled pipeline with a ragged last block (B % tile_b != 0).
    B3, H3 = 1200, 256
    tau3 = jax.random.uniform(k[6], (H3,), jnp.float32)
    x3 = jax.random.normal(k[7], (B3, H3), jnp.float32)
    state3 = jax.random.normal(k[8], (B3, H3), jnp.float32)
    expected3 = _reference(x3, state3, tau3)
    out3 = trace_layer_forward(x3, state3, tau3)
    jax.block_until_ready(out3)
    assert out3.shape == (B3, H3)
    assert jnp.allclose(out3, expected3, atol=1e-6), "mismatch (ragged case)"

    # 4) Larger lane-dense, evenly-divisible case (multiple grid steps).
    B4, H4 = 2048, 256
    tau4 = jax.random.uniform(k[9], (H4,), jnp.float32)
    x4 = jax.random.normal(k[10], (B4, H4), jnp.float32)
    state4 = jax.random.normal(k[11], (B4, H4), jnp.float32)
    expected4 = _reference(x4, state4, tau4)
    out4 = trace_layer_forward(x4, state4, tau4)
    jax.block_until_ready(out4)
    assert out4.shape == (B4, H4)
    assert jnp.allclose(out4, expected4, atol=1e-6), "mismatch (tiled case)"

    print("KERNEL_OK")
</pallas_src>

<mosaic_0001>
module attributes {stable_mosaic.version = 11 : i64} {
  func.func @_trace_kernel(%arg0: i32, %arg1: memref<1x32xf32, #tpu.memory_space<vmem>>, %arg2: memref<2x32xf32, #tpu.memory_space<vmem>>, %arg3: memref<2x32xf32, #tpu.memory_space<vmem>>, %arg4: memref<2x32xf32, #tpu.memory_space<vmem>>) attributes {dimension_semantics = [#tpu.dimension_semantics<parallel>], iteration_bounds = array<i64: 1>, scalar_prefetch = 0 : i64, scratch_operands = 0 : i64, tpu.core_type = #tpu.core_type<tc>, window_params = [{pipeline_mode = #tpu.pipeline_mode<synchronous>, transform_indices = @transform_0, window_bounds = array<i64: 1, 32>}, {transform_indices = @transform_1, window_bounds = array<i64: 2, 32>}, {transform_indices = @transform_2, window_bounds = array<i64: 2, 32>}, {transform_indices = @transform_3, window_bounds = array<i64: 2, 32>}]} {
    %c0 = arith.constant 0 : index
    %c0_0 = arith.constant 0 : index
    %0 = vector.load %arg3[%c0, %c0_0] : memref<2x32xf32, #tpu.memory_space<vmem>>, vector<2x32xf32>
    %c0_1 = arith.constant 0 : index
    %c0_2 = arith.constant 0 : index
    %1 = vector.load %arg2[%c0_1, %c0_2] : memref<2x32xf32, #tpu.memory_space<vmem>>, vector<2x32xf32>
    %c0_3 = arith.constant 0 : index
    %c0_4 = arith.constant 0 : index
    %2 = vector.load %arg1[%c0_3, %c0_4] : memref<1x32xf32, #tpu.memory_space<vmem>>, vector<1x32xf32>
    %3 = vector.broadcast %2 : vector<1x32xf32> to vector<2x32xf32>
    %4 = arith.mulf %0, %3 : vector<2x32xf32>
    %5 = arith.addf %4, %1 : vector<2x32xf32>
    %c0_5 = arith.constant 0 : index
    %c0_6 = arith.constant 0 : index
    %6 = vector.load %arg4[%c0_5, %c0_6] : memref<2x32xf32, #tpu.memory_space<vmem>>, vector<2x32xf32>
    tpu.vector_store %arg4[%c0_5, %c0_6], %5 {strides = array<i32>} : memref<2x32xf32, #tpu.memory_space<vmem>>, vector<2x32xf32>,
    return
  }
  func.func @transform_0(%arg0: i32) -> (i32, i32) {
    %c0_i32 = arith.constant 0 : i32
    %c0_i32_0 = arith.constant 0 : i32
    %c0_i32_1 = arith.constant 0 : i32
    return %c0_i32, %c0_i32_0 : i32, i32
  }
  func.func @transform_1(%arg0: i32) -> (i32, i32) {
    %c0_i32 = arith.constant 0 : i32
    %c0_i32_0 = arith.constant 0 : i32
    return %arg0, %c0_i32 : i32, i32
  }
  func.func @transform_2(%arg0: i32) -> (i32, i32) {
    %c0_i32 = arith.constant 0 : i32
    %c0_i32_0 = arith.constant 0 : i32
    return %arg0, %c0_i32 : i32, i32
  }
  func.func @transform_3(%arg0: i32) -> (i32, i32) {
    %c0_i32 = arith.constant 0 : i32
    %c0_i32_0 = arith.constant 0 : i32
    return %arg0, %c0_i32 : i32, i32
  }
}

</mosaic_0001>

<bundles_post_ra>
// kernel: tpu_custom_call.1
= control target key start
LH: loop header
LB: loop body
LE: loop exit
PB: predicated region body
PF: predicated region fallthrough
CT: control target
= control target key end

     0   :  { %8 = vsyncpa [#allocation3], 0  ;;  %s158_s0 = inlined_call_operand.vmem [shape: f32[1,32], index: 0, kind: input, shape index: {}]   ;;  %s159_s1 = inlined_call_operand.vmem [shape: f32[2,32], index: 1, kind: input, shape index: {}]   ;;  %s160_s2 = inlined_call_operand.hbm [shape: f32[2,32], index: 2, kind: input, shape index: {}, may-alias: {2,3}]   ;;  %s161_s3 = inlined_call_operand.hbm [shape: f32[2,32], index: 3, kind: output, shape index: {}, may-alias: {2,3}]  }
   0x1   :  { %9 = vsyncpa [#allocation4], 0  ;;  %s106_s12 = smov [#allocation2]   ;;  %s58_s16 = scalar_lea.hbm %s160_s2, 32 }
   0x2   :  { %s20_s13 = sshll.u32 %s106_s12, 4  ;;  %p59_p0 = scmp.ne.s32.totalorder %s160_s2, %s58_s16  ;;  %s21_s13 = int_to_ptr.vmem [resolvable:$true] %s20_s13 }
   0x3   :  { %p62_p1 = scmp.lt.u32.totalorder %s58_s16, %s160_s2 }
   0x5   :  { %p64_p2 = pnand %p62_p1, %p59_p0 }
   0x7   :  { %67 = shalt.err (!%p64_p2)
}
   0x8   :  { %s68_s21 = scalar_lea.vmem %s21_s13, 32  ;;  %p73_p4 = scmp.lt.s32.totalorder %s21_s13, %s21_s13 }
   0x9   :  { %p69_p3 = scmp.ne.s32.totalorder %s21_s13, %s68_s21  ;;  %p74_p5 = scmp.lt.s32.totalorder %s68_s21, %s68_s21 }
   0xb   :  { %p75_p6 = por %p74_p5, %p73_p4 }
   0xd   :  { %p76_p7 = pnand %p75_p6, %p69_p3 }
   0xf   :  { %79 = shalt.err (!%p76_p7)
}
  0x10   :  { %23 = dma.hbm_to_vmem [thread:$0]  %s160_s2, 32, %s21_s13, [#allocation3]  }
  0x11   :  { %102 = dma.done.wait [#allocation3], 32  }
  0x12   :  { %103 = vsyncadd [#allocation3], 4294967264  ;;  %s107_s24 = smov [#allocation5]   ;;  %v27_v0 = vld [vmem:[#allocation2] sm:$0x3]  ;;  %vm38_vm0 = vcmask 254976  }
  0x13   :  { %s46_s25 = sshll.u32 %s107_s24, 4  ;;  %v28_v1 = vld [vmem:[%s159_s1] sm:$0x3]  ;;  %s47_s25 = int_to_ptr.vmem [resolvable:$true] %s46_s25 }
  0x14   :  { %v55_v2 = vld [vmem:[%s158_s0] ss:$0 sm:$0xff]  ;;  %s80_s30 = scalar_lea.vmem %s47_s25, 32  ;;  %p85_p9 = scmp.lt.s32.totalorder %s47_s25, %s47_s25 }
  0x15   :  { %v36_v3 = vmul.f32 %v55_v2, %v27_v0  ;;  %p81_p8 = scmp.ne.s32.totalorder %s47_s25, %s80_s30  ;;  %p86_p10 = scmp.lt.s32.totalorder %s80_s30, %s80_s30 }
  0x17   :  { %v37_v4 = vadd.f32 %v36_v3, %v28_v1  ;;  %p87_p11 = por %p86_p10, %p85_p9 }
  0x19   :  { %39 = vst.msk [vmem:[#allocation5] sm:$0x3] %vm38_vm0, %v37_v4  ;;  %p88_p12 = pnand %p87_p11, %p81_p8 }
  0x1b   :  { %91 = shalt.err (!%p88_p12)
}
  0x1c   :  { %s92_s1 = scalar_lea.hbm %s161_s3, 32 }
  0x1d   :  { %p93_p13 = scmp.ne.s32.totalorder %s161_s3, %s92_s1  ;;  %p96_p0 = scmp.lt.u32.totalorder %s92_s1, %s161_s3 }
  0x1f   :  { %p98_p1 = pnand %p96_p0, %p93_p13 }
  0x21   :  { %101 = shalt.err (!%p98_p1)
}
  0x22   :  { %49 = dma.vmem_to_hbm [thread:$0]  %s47_s25, 32, %s161_s3, [#allocation4]  }
  0x23   :  { %104 = dma.done.wait [#allocation4], 32  }
  0x24   :  { %105 = vsyncadd [#allocation4], 4294967264 }
  0x25   :  { %53 = vsyncpa [#allocation3], 1 }
  0x26   :  { %54 = vsyncpa [#allocation4], 1 }

</bundles_post_ra>
